<compile_context>
chip_gen: v7x
topology: tpu7x:2x2x1
jax: 0.10.0
libtpu: 0.0.40
codegen_flags: <defaults>
</compile_context>

<pallas_src>
import functools

import jax
import jax.numpy as jnp
from jax.experimental import pallas as pl
from jax.experimental.pallas import tpu as pltpu


# ----------------------------- kernel ---------------------------------------


def _ensemble_kernel(x_ref, w1_ref, b1_ref, w2_ref, bias_ref, o_ref, acc_ref):
    k = pl.program_id(1)

    @pl.when(k == 0)
    def _():
        acc_ref[...] = jnp.zeros_like(acc_ref)

    # hidden_k = relu(x @ W1s[:, k-tile] + b1s[k-tile])        (TB, TK), f32
    h = jnp.dot(x_ref[...], w1_ref[...], preferred_element_type=jnp.float32)
    h = jnp.maximum(h + b1_ref[...], 0.0)
    # acc += hidden_k @ W2f[k-tile, :]                          (TB, O_pad), f32
    acc_ref[...] += jnp.dot(
        h.astype(w2_ref.dtype), w2_ref[...], preferred_element_type=jnp.float32
    )

    @pl.when(k == pl.num_programs(1) - 1)
    def _():
        o_ref[...] = (acc_ref[...] + bias_ref[...]).astype(o_ref.dtype)


# --------------------------- wrapper helpers --------------------------------


def _round_up(n, m):
    return ((n + m - 1) // m) * m


def _pick_batch_tile(batch):
    b8 = _round_up(batch, 8)
    if b8 <= 8:
        return 8
    # Prefer >=2 grid steps so v7x's second TensorCore gets work, but keep the
    # tiles large (up to 512 rows) to amortize the ~0.35us/step pipeline cost.
    return min(512, _round_up(pl.cdiv(b8, 2), 8))


def _pick_k_tile(nh_pad, max_tk=2048):
    tk = min(nh_pad, max_tk)
    while nh_pad % tk:  # nh_pad is a multiple of 128, so this terminates at 128
        tk -= 128
    return tk


def prepare_ensemble_params(
    w1, b1, w2, b2, coef, net_to_output, n_outputs, compute_dtype=jnp.bfloat16
):
    """One-time algebraic fusion of all base networks (hoisted out of forward).

    w1: (N, F, H), b1: (N, 1, H), w2: (N, H, 1), b2: (N,)
    coef: (N,) ensemble weights, net_to_output: (N,) output column per net.
    Returns (W1s, b1s, W2f, bias):
      W1s  (F, NH_pad)      bf16  stacked first layers (lane-padded)
      b1s  (1, NH_pad)      f32   stacked first-layer biases
      W2f  (NH_pad, O_pad)  bf16  second layers with coef / one-hot scatter folded
      bias (1, O_pad)       f32   sum_n coef_n * b2_n scattered to its output col
    """
    N, F, H = w1.shape
    O = n_outputs
    NH = N * H
    NH_pad = _round_up(NH, 128)
    O_pad = _round_up(max(O, 128), 128)

    w1_stacked = jnp.transpose(w1, (1, 0, 2)).reshape(F, NH)            # (F, NH)
    b1_stacked = b1.reshape(1, NH)                                      # (1, NH)
    onehot = jax.nn.one_hot(net_to_output, O, dtype=jnp.float32)        # (N, O)
    w2_fused = (coef[:, None, None] * w2) * onehot[:, None, :]          # (N, H, O)
    w2_fused = w2_fused.reshape(NH, O)                                  # (NH, O)
    bias = ((coef * b2)[:, None] * onehot).sum(axis=0, keepdims=True)   # (1, O)

    # Lane-dense padding: zeros are inert through relu and the second matmul.
    w1_stacked = jnp.pad(w1_stacked, ((0, 0), (0, NH_pad - NH)))
    b1_stacked = jnp.pad(b1_stacked, ((0, 0), (0, NH_pad - NH)))
    w2_fused = jnp.pad(w2_fused, ((0, NH_pad - NH), (0, O_pad - O)))
    bias = jnp.pad(bias, ((0, 0), (0, O_pad - O)))

    return (
        w1_stacked.astype(compute_dtype),
        b1_stacked.astype(jnp.float32),
        w2_fused.astype(compute_dtype),
        bias.astype(jnp.float32),
    )


def ensemble_forward(x, params, n_outputs, single_buffer_weights=True):
    """EnsembleRegressor.forward using pre-fused params (only x moves per call)."""
    w1s, b1s, w2f, bias = params
    B, F = x.shape
    NH_pad = w1s.shape[1]
    O_pad = w2f.shape[1]

    TB = _pick_batch_tile(B)
    n_b = pl.cdiv(B, TB)
    B_pad = n_b * TB
    TK = _pick_k_tile(NH_pad)
    n_k = NH_pad // TK

    xq = x.astype(w1s.dtype)
    if B_pad != B:
        xq = jnp.pad(xq, ((0, B_pad - B), (0, 0)))

    # Grid-invariant operands can be single-buffered (halves their VMEM footprint
    # -> matters on v7x's 64 MiB).  When the K axis streams weights (n_k > 1),
    # leave the default double-buffering so the DMAs pipeline.
    const_mode = pl.Buffered(1) if single_buffer_weights else None
    weight_mode = const_mode if n_k == 1 else None

    out = pl.pallas_call(
        _ensemble_kernel,
        out_shape=jax.ShapeDtypeStruct((B_pad, O_pad), jnp.float32),
        grid_spec=pltpu.PrefetchScalarGridSpec(
            num_scalar_prefetch=0,
            grid=(n_b, n_k),
            in_specs=[
                pl.BlockSpec((TB, F), lambda i, k: (i, 0)),                  # x tile
                pl.BlockSpec((F, TK), lambda i, k: (0, k),
                             pipeline_mode=weight_mode),                     # W1s
                pl.BlockSpec((1, TK), lambda i, k: (0, k),
                             pipeline_mode=weight_mode),                     # b1s
                pl.BlockSpec((TK, O_pad), lambda i, k: (k, 0),
                             pipeline_mode=weight_mode),                     # W2f
                pl.BlockSpec((1, O_pad), lambda i, k: (0, 0),
                             pipeline_mode=const_mode),                      # bias
            ],
            out_specs=pl.BlockSpec((TB, O_pad), lambda i, k: (i, 0)),
            scratch_shapes=[pltpu.VMEM((TB, O_pad), jnp.float32)],
        ),
        compiler_params=pltpu.CompilerParams(
            dimension_semantics=("parallel", "arbitrary"),
            vmem_limit_bytes=48 * 1024 * 1024,
        ),
    )(xq, w1s, b1s, w2f, bias)

    # TODO(synk): in real use, keep this slice inside the caller's jit (or consume
    # the padded (B_pad, O_pad) buffer directly) so it fuses instead of making an
    # extra HBM pass over the 128-wide padded output.
    return out[:B, :n_outputs]


# ----------------------------- reference ------------------------------------


def reference_forward(x, w1, b1, w2, b2, coef, net_to_output, n_outputs):
    # Pure-JAX f32 reference mirroring the PyTorch double loop.
    B = x.shape[0]
    y = jnp.zeros((B, n_outputs), dtype=jnp.float32)
    for n in range(w1.shape[0]):
        h = jnp.maximum(x @ w1[n] + b1[n], 0.0)          # (B, H)
        pred = (h @ w2[n])[:, 0] + b2[n]                 # (B,)  == squeeze(net(x))
        y = y.at[:, int(net_to_output[n])].add(coef[n] * pred)
    return y


if __name__ == "__main__":
    B, F, H = 8, 32, 32          # batch, n_features, hidden width of base MLPs
    O, E = 2, 3                  # n_outputs, estimators per output
    N = O * E                    # total number of base networks

    key = jax.random.PRNGKey(0)
    kx, kw1, kb1, kw2, kb2 = jax.random.split(key, 5)

    x = jax.random.normal(kx, (B, F), dtype=jnp.float32)
    w1 = jax.random.normal(kw1, (N, F, H), dtype=jnp.float32) * 0.1
    b1 = jax.random.normal(kb1, (N, 1, H), dtype=jnp.float32) * 0.1
    w2 = jax.random.normal(kw2, (N, H, 1), dtype=jnp.float32) * 0.1
    b2 = jax.random.normal(kb2, (N,), dtype=jnp.float32) * 0.1

    # EnsembleRegressor.__init__: uniform weights 1/len(networks[i_output])
    coef = jnp.full((N,), 1.0 / E, dtype=jnp.float32)
    # net n belongs to output n // E
    net_to_output = jnp.arange(N, dtype=jnp.int32) // E

    # One-time fusion (cached across forwards); only x flows per call below.
    params = jax.tree.map(
        jax.block_until_ready,
        prepare_ensemble_params(w1, b1, w2, b2, coef, net_to_output, O),
    )

    fwd = jax.jit(
        ensemble_forward, static_argnames=("n_outputs", "single_buffer_weights")
    )
    try:
        y = fwd(x, params, n_outputs=O, single_buffer_weights=True)
        jax.block_until_ready(y)
    except Exception:
        # Fallback if this jax build rejects single-buffered (Buffered(1)) specs.
        y = fwd(x, params, n_outputs=O, single_buffer_weights=False)
        jax.block_until_ready(y)

    y_ref = reference_forward(x, w1, b1, w2, b2, coef, net_to_output, O)
    assert y.shape == (B, O)
    # bf16 matmul operands with f32 accumulation -> loosened tolerance vs f32 ref.
    assert jnp.allclose(y, y_ref, atol=2e-2, rtol=2e-2), "mismatch vs reference"

    print("KERNEL_OK")
</pallas_src>

<mosaic_0001>
module attributes {stable_mosaic.version = 11 : i64} {
  func.func @_ensemble_kernel(%arg0: i32, %arg1: i32, %arg2: memref<8x32xbf16, #tpu.memory_space<vmem>>, %arg3: memref<32x256xbf16, #tpu.memory_space<vmem>>, %arg4: memref<1x256xf32, #tpu.memory_space<vmem>>, %arg5: memref<256x128xbf16, #tpu.memory_space<vmem>>, %arg6: memref<1x128xf32, #tpu.memory_space<vmem>>, %arg7: memref<8x128xf32, #tpu.memory_space<vmem>>, %arg8: memref<8x128xf32, #tpu.memory_space<vmem>>) attributes {dimension_semantics = [#tpu.dimension_semantics<parallel>, #tpu.dimension_semantics<arbitrary>], iteration_bounds = array<i64: 1, 1>, scalar_prefetch = 0 : i64, scratch_operands = 1 : i64, tpu.core_type = #tpu.core_type<tc>, window_params = [{transform_indices = @transform_0, window_bounds = array<i64: 8, 32>}, {pipeline_mode = #tpu.pipeline_mode<synchronous>, transform_indices = @transform_1, window_bounds = array<i64: 32, 256>}, {pipeline_mode = #tpu.pipeline_mode<synchronous>, transform_indices = @transform_2, window_bounds = array<i64: 1, 256>}, {pipeline_mode = #tpu.pipeline_mode<synchronous>, transform_indices = @transform_3, window_bounds = array<i64: 256, 128>}, {pipeline_mode = #tpu.pipeline_mode<synchronous>, transform_indices = @transform_4, window_bounds = array<i64: 1, 128>}, {transform_indices = @transform_5, window_bounds = array<i64: 8, 128>}]} {
    %c0_i32 = arith.constant 0 : i32
    %0 = arith.cmpi eq, %arg1, %c0_i32 : i32
    %1 = arith.extui %0 : i1 to i32
    %c0_i32_0 = arith.constant 0 : i32
    %2 = arith.cmpi ne, %1, %c0_i32_0 : i32
    scf.if %2 {
      %cst_16 = arith.constant 0.000000e+00 : f32
      %20 = vector.broadcast %cst_16 : f32 to vector<8x128xf32>
      %c0_17 = arith.constant 0 : index
      %c0_18 = arith.constant 0 : index
      %21 = vector.load %arg8[%c0_17, %c0_18] : memref<8x128xf32, #tpu.memory_space<vmem>>, vector<8x128xf32>
      tpu.vector_store %arg8[%c0_17, %c0_18], %20 {strides = array<i32>} : memref<8x128xf32, #tpu.memory_space<vmem>>, vector<8x128xf32>,
    } else {
    }
    %c0 = arith.constant 0 : index
    %c0_1 = arith.constant 0 : index
    %3 = vector.load %arg2[%c0, %c0_1] : memref<8x32xbf16, #tpu.memory_space<vmem>>, vector<8x32xbf16>
    %c0_2 = arith.constant 0 : index
    %c0_3 = arith.constant 0 : index
    %4 = vector.load %arg3[%c0_2, %c0_3] : memref<32x256xbf16, #tpu.memory_space<vmem>>, vector<32x256xbf16>
    %cst = arith.constant dense<0.000000e+00> : vector<8x256xf32>
    %5 = tpu.matmul %3, %4, %cst {dimension_numbers = #tpu.dot_dimension_numbers<[1], [0], [0], [1], [0, 0, 1, 1], [], []>} : vector<8x32xbf16>, vector<32x256xbf16>, vector<8x256xf32> -> vector<8x256xf32>
    %c0_4 = arith.constant 0 : index
    %c0_5 = arith.constant 0 : index
    %6 = vector.load %arg4[%c0_4, %c0_5] : memref<1x256xf32, #tpu.memory_space<vmem>>, vector<1x256xf32>
    %7 = vector.broadcast %6 : vector<1x256xf32> to vector<8x256xf32>
    %8 = arith.addf %5, %7 : vector<8x256xf32>
    %cst_6 = arith.constant 0.000000e+00 : f32
    %9 = vector.broadcast %cst_6 : f32 to vector<8x256xf32>
    %10 = arith.maximumf %8, %9 : vector<8x256xf32>
    %c0_7 = arith.constant 0 : index
    %c0_8 = arith.constant 0 : index
    %11 = vector.load %arg8[%c0_7, %c0_8] : memref<8x128xf32, #tpu.memory_space<vmem>>, vector<8x128xf32>
    %12 = arith.truncf %10 : vector<8x256xf32> to vector<8x256xbf16>
    %c0_9 = arith.constant 0 : index
    %c0_10 = arith.constant 0 : index
    %13 = vector.load %arg5[%c0_9, %c0_10] : memref<256x128xbf16, #tpu.memory_space<vmem>>, vector<256x128xbf16>
    %cst_11 = arith.constant dense<0.000000e+00> : vector<8x128xf32>
    %14 = tpu.matmul %12, %13, %cst_11 {dimension_numbers = #tpu.dot_dimension_numbers<[1], [0], [0], [1], [0, 0, 1, 1], [], []>} : vector<8x256xbf16>, vector<256x128xbf16>, vector<8x128xf32> -> vector<8x128xf32>
    %15 = arith.addf %11, %14 : vector<8x128xf32>
    %c0_12 = arith.constant 0 : index
    %c0_13 = arith.constant 0 : index
    %16 = vector.load %arg8[%c0_12, %c0_13] : memref<8x128xf32, #tpu.memory_space<vmem>>, vector<8x128xf32>
    tpu.vector_store %arg8[%c0_12, %c0_13], %15 {strides = array<i32>} : memref<8x128xf32, #tpu.memory_space<vmem>>, vector<8x128xf32>,
    %c0_i32_14 = arith.constant 0 : i32
    %17 = arith.cmpi eq, %arg1, %c0_i32_14 : i32
    %18 = arith.extui %17 : i1 to i32
    %c0_i32_15 = arith.constant 0 : i32
    %19 = arith.cmpi ne, %18, %c0_i32_15 : i32
    scf.if %19 {
      %c0_16 = arith.constant 0 : index
      %c0_17 = arith.constant 0 : index
      %20 = vector.load %arg8[%c0_16, %c0_17] : memref<8x128xf32, #tpu.memory_space<vmem>>, vector<8x128xf32>
      %c0_18 = arith.constant 0 : index
      %c0_19 = arith.constant 0 : index
      %21 = vector.load %arg6[%c0_18, %c0_19] : memref<1x128xf32, #tpu.memory_space<vmem>>, vector<1x128xf32>
      %22 = vector.broadcast %21 : vector<1x128xf32> to vector<8x128xf32>
      %23 = arith.addf %20, %22 : vector<8x128xf32>
      %c0_20 = arith.constant 0 : index
      %c0_21 = arith.constant 0 : index
      %24 = vector.load %arg7[%c0_20, %c0_21] : memref<8x128xf32, #tpu.memory_space<vmem>>, vector<8x128xf32>
      tpu.vector_store %arg7[%c0_20, %c0_21], %23 {strides = array<i32>} : memref<8x128xf32, #tpu.memory_space<vmem>>, vector<8x128xf32>,
    } else {
    }
    return
  }
  func.func @transform_0(%arg0: i32, %arg1: i32) -> (i32, i32) {
    %c0_i32 = arith.constant 0 : i32
    %c0_i32_0 = arith.constant 0 : i32
    return %arg0, %c0_i32 : i32, i32
  }
  func.func @transform_1(%arg0: i32, %arg1: i32) -> (i32, i32) {
    %c0_i32 = arith.constant 0 : i32
    %c0_i32_0 = arith.constant 0 : i32
    return %c0_i32, %arg1 : i32, i32
  }
  func.func @transform_2(%arg0: i32, %arg1: i32) -> (i32, i32) {
    %c0_i32 = arith.constant 0 : i32
    %c0_i32_0 = arith.constant 0 : i32
    return %c0_i32, %arg1 : i32, i32
  }
  func.func @transform_3(%arg0: i32, %arg1: i32) -> (i32, i32) {
    %c0_i32 = arith.constant 0 : i32
    %c0_i32_0 = arith.constant 0 : i32
    return %arg1, %c0_i32 : i32, i32
  }
  func.func @transform_4(%arg0: i32, %arg1: i32) -> (i32, i32) {
    %c0_i32 = arith.constant 0 : i32
    %c0_i32_0 = arith.constant 0 : i32
    %c0_i32_1 = arith.constant 0 : i32
    return %c0_i32, %c0_i32_0 : i32, i32
  }
  func.func @transform_5(%arg0: i32, %arg1: i32) -> (i32, i32) {
    %c0_i32 = arith.constant 0 : i32
    %c0_i32_0 = arith.constant 0 : i32
    return %arg0, %c0_i32 : i32, i32
  }
}

module attributes {stable_mosaic.version = 11 : i64} {
  func.func @_ensemble_kernel(%arg0: i32, %arg1: i32, %arg2: memref<8x32xbf16, #tpu.memory_space<vmem>>, %arg3: memref<32x256xbf16, #tpu.memory_space<vmem>>, %arg4: memref<1x256xf32, #tpu.memory_space<vmem>>, %arg5: memref<256x128xbf16, #tpu.memory_space<vmem>>, %arg6: memref<1x128xf32, #tpu.memory_space<vmem>>, %arg7: memref<8x128xf32, #tpu.memory_space<vmem>>, %arg8: memref<8x128xf32, #tpu.memory_space<vmem>>) attributes {dimension_semantics = [#tpu.dimension_semantics<parallel>, #tpu.dimension_semantics<arbitrary>], iteration_bounds = array<i64: 1, 1>, scalar_prefetch = 0 : i64, scratch_operands = 1 : i64, tpu.core_type = #tpu.core_type<tc>, window_params = [{transform_indices = @transform_0, window_bounds = array<i64: 8, 32>}, {transform_indices = @transform_1, window_bounds = array<i64: 32, 256>}, {transform_indices = @transform_2, window_bounds = array<i64: 1, 256>}, {transform_indices = @transform_3, window_bounds = array<i64: 256, 128>}, {pipeline_mode = #tpu.pipeline_mode<synchronous>, transform_indices = @transform_4, window_bounds = array<i64: 1, 128>}, {transform_indices = @transform_5, window_bounds = array<i64: 8, 128>}]} {
    %c0_i32 = arith.constant 0 : i32
    %0 = arith.cmpi eq, %arg1, %c0_i32 : i32
    %1 = arith.extui %0 : i1 to i32
    %c0_i32_0 = arith.constant 0 : i32
    %2 = arith.cmpi ne, %1, %c0_i32_0 : i32
    scf.if %2 {
      %cst_16 = arith.constant 0.000000e+00 : f32
      %20 = vector.broadcast %cst_16 : f32 to vector<8x128xf32>
      %c0_17 = arith.constant 0 : index
      %c0_18 = arith.constant 0 : index
      %21 = vector.load %arg8[%c0_17, %c0_18] : memref<8x128xf32, #tpu.memory_space<vmem>>, vector<8x128xf32>
      tpu.vector_store %arg8[%c0_17, %c0_18], %20 {strides = array<i32>} : memref<8x128xf32, #tpu.memory_space<vmem>>, vector<8x128xf32>,
    } else {
    }
    %c0 = arith.constant 0 : index
    %c0_1 = arith.constant 0 : index
    %3 = vector.load %arg2[%c0, %c0_1] : memref<8x32xbf16, #tpu.memory_space<vmem>>, vector<8x32xbf16>
    %c0_2 = arith.constant 0 : index
    %c0_3 = arith.constant 0 : index
    %4 = vector.load %arg3[%c0_2, %c0_3] : memref<32x256xbf16, #tpu.memory_space<vmem>>, vector<32x256xbf16>
    %cst = arith.constant dense<0.000000e+00> : vector<8x256xf32>
    %5 = tpu.matmul %3, %4, %cst {dimension_numbers = #tpu.dot_dimension_numbers<[1], [0], [0], [1], [0, 0, 1, 1], [], []>} : vector<8x32xbf16>, vector<32x256xbf16>, vector<8x256xf32> -> vector<8x256xf32>
    %c0_4 = arith.constant 0 : index
    %c0_5 = arith.constant 0 : index
    %6 = vector.load %arg4[%c0_4, %c0_5] : memref<1x256xf32, #tpu.memory_space<vmem>>, vector<1x256xf32>
    %7 = vector.broadcast %6 : vector<1x256xf32> to vector<8x256xf32>
    %8 = arith.addf %5, %7 : vector<8x256xf32>
    %cst_6 = arith.constant 0.000000e+00 : f32
    %9 = vector.broadcast %cst_6 : f32 to vector<8x256xf32>
    %10 = arith.maximumf %8, %9 : vector<8x256xf32>
    %c0_7 = arith.constant 0 : index
    %c0_8 = arith.constant 0 : index
    %11 = vector.load %arg8[%c0_7, %c0_8] : memref<8x128xf32, #tpu.memory_space<vmem>>, vector<8x128xf32>
    %12 = arith.truncf %10 : vector<8x256xf32> to vector<8x256xbf16>
    %c0_9 = arith.constant 0 : index
    %c0_10 = arith.constant 0 : index
    %13 = vector.load %arg5[%c0_9, %c0_10] : memref<256x128xbf16, #tpu.memory_space<vmem>>, vector<256x128xbf16>
    %cst_11 = arith.constant dense<0.000000e+00> : vector<8x128xf32>
    %14 = tpu.matmul %12, %13, %cst_11 {dimension_numbers = #tpu.dot_dimension_numbers<[1], [0], [0], [1], [0, 0, 1, 1], [], []>} : vector<8x256xbf16>, vector<256x128xbf16>, vector<8x128xf32> -> vector<8x128xf32>
    %15 = arith.addf %11, %14 : vector<8x128xf32>
    %c0_12 = arith.constant 0 : index
    %c0_13 = arith.constant 0 : index
    %16 = vector.load %arg8[%c0_12, %c0_13] : memref<8x128xf32, #tpu.memory_space<vmem>>, vector<8x128xf32>
    tpu.vector_store %arg8[%c0_12, %c0_13], %15 {strides = array<i32>} : memref<8x128xf32, #tpu.memory_space<vmem>>, vector<8x128xf32>,
    %c0_i32_14 = arith.constant 0 : i32
    %17 = arith.cmpi eq, %arg1, %c0_i32_14 : i32
    %18 = arith.extui %17 : i1 to i32
    %c0_i32_15 = arith.constant 0 : i32
    %19 = arith.cmpi ne, %18, %c0_i32_15 : i32
    scf.if %19 {
      %c0_16 = arith.constant 0 : index
      %c0_17 = arith.constant 0 : index
      %20 = vector.load %arg8[%c0_16, %c0_17] : memref<8x128xf32, #tpu.memory_space<vmem>>, vector<8x128xf32>
      %c0_18 = arith.constant 0 : index
      %c0_19 = arith.constant 0 : index
      %21 = vector.load %arg6[%c0_18, %c0_19] : memref<1x128xf32, #tpu.memory_space<vmem>>, vector<1x128xf32>
      %22 = vector.broadcast %21 : vector<1x128xf32> to vector<8x128xf32>
      %23 = arith.addf %20, %22 : vector<8x128xf32>
      %c0_20 = arith.constant 0 : index
      %c0_21 = arith.constant 0 : index
      %24 = vector.load %arg7[%c0_20, %c0_21] : memref<8x128xf32, #tpu.memory_space<vmem>>, vector<8x128xf32>
      tpu.vector_store %arg7[%c0_20, %c0_21], %23 {strides = array<i32>} : memref<8x128xf32, #tpu.memory_space<vmem>>, vector<8x128xf32>,
    } else {
    }
    return
  }
  func.func @transform_0(%arg0: i32, %arg1: i32) -> (i32, i32) {
    %c0_i32 = arith.constant 0 : i32
    %c0_i32_0 = arith.constant 0 : i32
    return %arg0, %c0_i32 : i32, i32
  }
  func.func @transform_1(%arg0: i32, %arg1: i32) -> (i32, i32) {
    %c0_i32 = arith.constant 0 : i32
    %c0_i32_0 = arith.constant 0 : i32
    return %c0_i32, %arg1 : i32, i32
  }
  func.func @transform_2(%arg0: i32, %arg1: i32) -> (i32, i32) {
    %c0_i32 = arith.constant 0 : i32
    %c0_i32_0 = arith.constant 0 : i32
    return %c0_i32, %arg1 : i32, i32
  }
  func.func @transform_3(%arg0: i32, %arg1: i32) -> (i32, i32) {
    %c0_i32 = arith.constant 0 : i32
    %c0_i32_0 = arith.constant 0 : i32
    return %arg1, %c0_i32 : i32, i32
  }
  func.func @transform_4(%arg0: i32, %arg1: i32) -> (i32, i32) {
    %c0_i32 = arith.constant 0 : i32
    %c0_i32_0 = arith.constant 0 : i32
    %c0_i32_1 = arith.constant 0 : i32
    return %c0_i32, %c0_i32_0 : i32, i32
  }
  func.func @transform_5(%arg0: i32, %arg1: i32) -> (i32, i32) {
    %c0_i32 = arith.constant 0 : i32
    %c0_i32_0 = arith.constant 0 : i32
    return %arg0, %c0_i32 : i32, i32
  }
}

</mosaic_0001>

<bundles_post_ra>
// kernel: ensemble_forward.1
= control target key start
LH: loop header
LB: loop body
LE: loop exit
PB: predicated region body
PF: predicated region fallthrough
CT: control target
= control target key end

     0   :  { %10 = vsyncpa [#allocation4], 0  ;;  %s524_s0 = inlined_call_operand.vmem [shape: bf16[8,32], index: 0, kind: input, shape index: {}]   ;;  %s525_s1 = inlined_call_operand.hbm [shape: bf16[32,256], index: 1, kind: input, shape index: {}]   ;;  %s526_s2 = inlined_call_operand.vmem [shape: f32[1,256], index: 2, kind: input, shape index: {}]   ;;  %s527_s3 = inlined_call_operand.hbm [shape: bf16[256,128], index: 3, kind: input, shape index: {}]   ;;  %s528_s4 = inlined_call_operand.vmem [shape: f32[1,128], index: 4, kind: input, shape index: {}]   ;;  %s529_s5 = inlined_call_operand.vmem [shape: f32[8,128], index: 5, kind: output, shape index: {}]  }
   0x1   :  { %11 = vsyncpa [#allocation6], 0  ;;  %s451_s18 = smov [#allocation3]   ;;  %s403_s22 = scalar_lea.hbm %s525_s1, 512 }
   0x2   :  { %s19_s19 = sshll.u32 %s451_s18, 4  ;;  %p404_p0 = scmp.ne.s32.totalorder %s525_s1, %s403_s22  ;;  %s20_s19 = int_to_ptr.vmem [resolvable:$true] %s19_s19 }
   0x3   :  { %p407_p1 = scmp.lt.u32.totalorder %s403_s22, %s525_s1 }
   0x5   :  { %p409_p2 = pnand %p407_p1, %p404_p0 }
   0x7   :  { %412 = shalt.err (!%p409_p2)
}
   0x8   :  { %s413_s27 = scalar_lea.vmem %s20_s19, 512  ;;  %p418_p4 = scmp.lt.s32.totalorder %s20_s19, %s20_s19 }
   0x9   :  { %p414_p3 = scmp.ne.s32.totalorder %s20_s19, %s413_s27  ;;  %p419_p5 = scmp.lt.s32.totalorder %s413_s27, %s413_s27 }
   0xb   :  { %p420_p6 = por %p419_p5, %p418_p4 }
   0xd   :  { %p421_p7 = pnand %p420_p6, %p414_p3 }
   0xf   :  { %424 = shalt.err (!%p421_p7)
}
  0x10   :  { %s452_s28 = smov 128   ;;  %s453_s29 = smov 8  }
  0x11   :  { %25 = dma.hbm_to_vmem [thread:$0]  %s525_s1, 512, %s20_s19, [#allocation4], %s452_s28, %s452_s28, %s453_s29  }
  0x12   :  { %s454_s7 = smov [#allocation5]   ;;  %s425_s11 = scalar_lea.hbm %s527_s3, 2048 }
  0x13   :  { %s33_s8 = sshll.u32 %s454_s7, 4  ;;  %p426_p8 = scmp.ne.s32.totalorder %s527_s3, %s425_s11  ;;  %s34_s8 = int_to_ptr.vmem [resolvable:$true] %s33_s8 }
  0x14   :  { %p429_p9 = scmp.lt.u32.totalorder %s425_s11, %s527_s3 }
  0x16   :  { %p431_p10 = pnand %p429_p9, %p426_p8 }
  0x18   :  { %434 = shalt.err (!%p431_p10)
}
  0x19   :  { %s435_s16 = scalar_lea.vmem %s34_s8, 2048  ;;  %p440_p12 = scmp.lt.s32.totalorder %s34_s8, %s34_s8 }
  0x1a   :  { %p436_p11 = scmp.ne.s32.totalorder %s34_s8, %s435_s16  ;;  %p441_p13 = scmp.lt.s32.totalorder %s435_s16, %s435_s16 }
  0x1c   :  { %p442_p0 = por %p441_p13, %p440_p12 }
  0x1e   :  { %p443_p1 = pnand %p442_p0, %p436_p11 }
  0x20   :  { %446 = shalt.err (!%p443_p1)
}
  0x21   :  { %s455_s1 = smov 64   ;;  %s456_s17 = smov 4  }
  0x22   :  { %39 = dma.hbm_to_vmem [thread:$0]  %s527_s3, 2048, %s34_s8, [#allocation6], %s455_s1, %s455_s1, %s456_s17  }
  0x23   :  { %447 = dma.done.wait [#allocation4], 512  }
  0x24   :  { %448 = vsyncadd [#allocation4], 4294966784 }
  0x25   :  { %449 = dma.done.wait [#allocation6], 2048  }
  0x26   :  { %450 = vsyncadd [#allocation6], 4294965248  ;;  %v457_v0 = vmov 0   ;;  %v381_v1 = vld [vmem:[#allocation3 + $0x4] ss:$8 sps:$4 sm:$0xff]   ;;  %vm91_vm0 = vcmask 261120   ;;  %v61_v22 = vlaneseq }
  0x27   :  { %127 = vmatprep.mubr.bf16.mxu0 %v457_v0  ;;  %v383_v2 = vld [vmem:[#allocation3] ss:$8 sps:$4 sm:$0xff]   ;;  %95 = vmatprep.subr.bf16.mxu0 %v381_v1  ;;  %v384_v3 = vld [vmem:[#allocation3 + $0x14] ss:$8 sps:$4 sm:$0xff]   ;;  %v386_v4 = vld [vmem:[#allocation3 + $0x10] ss:$8 sps:$4 sm:$0xff]  }
  0x28   :  { %96 = vmatpush1.bf16.msra.mxu0 %v383_v2  ;;  %v387_v5 = vld [vmem:[#allocation5 + $0x40] sm:$0xff]   ;;  %v389_v8 = vld [vmem:[#allocation5 + $0x48] sm:$0xff]   ;;  %v391_v10 = vld [vmem:[#allocation5 + $0x50] sm:$0xff]   ;;  %v62_v23 = vshrl.u32 %v61_v22, 7 }
  0x29   :  { %97 = vmatprep.subr.bf16.mxu0 %v384_v3  ;;  %v388_v6 = vld [vmem:[#allocation5] sm:$0xff]   ;;  %352 = vmatprep.subr.bf16.mxu1 %v387_v5  ;;  %v390_v9 = vld [vmem:[#allocation5 + $0x8] sm:$0xff]   ;;  %v392_v11 = vld [vmem:[#allocation5 + $0x10] sm:$0xff]  }
  0x2a   :  { %v54_v7 = vld [vmem:[%s524_s0] sm:$0xf]  ;;  %353 = vmatpush3.bf16.msra.mxu1 %v388_v6  ;;  %v393_v12 = vld [vmem:[#allocation5 + $0x58] sm:$0xff]   ;;  %v397_v16 = vld [vmem:[#allocation5 + $0x68] sm:$0xff]   ;;  %v63_v24 = vsub.s32 0, %v62_v23  ;;  %v67_v26 = vsub.s32 1, %v62_v23 }
  0x2b   :  { %354 = vmatprep.subr.bf16.mxu1 %v389_v8  ;;  %v394_v13 = vld [vmem:[#allocation5 + $0x18] sm:$0xff]   ;;  %v395_v14 = vld [vmem:[#allocation5 + $0x60] sm:$0xff]   ;;  %v398_v17 = vld [vmem:[#allocation5 + $0x28] sm:$0xff]  }
  0x2c   :  { %98 = vmatpush1.bf16.msra.mxu0 %v386_v4  ;;  %v396_v15 = vld [vmem:[#allocation5 + $0x20] sm:$0xff]   ;;  %v399_v18 = vld [vmem:[#allocation5 + $0x70] sm:$0xff]   ;;  %v401_v20 = vld [vmem:[#allocation5 + $0x78] sm:$0xff]  }
  0x2d   :  { %v400_v19 = vld [vmem:[#allocation5 + $0x30] sm:$0xff]   ;;  %v402_v21 = vld [vmem:[#allocation5 + $0x38] sm:$0xff]   ;;  %v59_v25 = vld [vmem:[%s526_s2] sm:$0x3] }
  0x2e   :  { %355 = vmatpush3.bf16.msra.mxu1 %v390_v9  ;;  %v64_v27 = vrot.slane %v59_v25, %v63_v24  ;;  %v68_v28 = vrot.slane %v59_v25, %v67_v26  ;;  %v351_v41 = vld [vmem:[%s528_s4] ss:$0 sm:$0xff] }
  0x2f   :  { %334 = vmatmul.mubr.msk.bf16.vlgmr.msra.gmra.mrb[0].mxu0 %vm91_vm0, %v54_v7  ;;  %356 = vmatprep.subr.bf16.mxu1 %v391_v10 }
  0x32   :  { %357 = vmatpush3.bf16.msra.mxu1 %v392_v11 }
  0x33   :  { %358 = vmatprep.subr.bf16.mxu1 %v393_v12 }
  0x36   :  { %359 = vmatpush3.bf16.msra.mxu1 %v394_v13 }
  0x37   :  { %360 = vmatprep.subr.bf16.mxu1 %v395_v14 }
  0x3a   :  { %361 = vmatpush3.bf16.msra.mxu1 %v396_v15 }
  0x3b   :  { %362 = vmatprep.subr.bf16.mxu1 %v397_v16 }
  0x3e   :  { %363 = vmatpush3.bf16.msra.mxu1 %v398_v17 }
  0x3f   :  { %364 = vmatprep.subr.bf16.mxu1 %v399_v18 }
  0x42   :  { %365 = vmatpush3.bf16.msra.mxu1 %v400_v19 }
  0x43   :  { %366 = vmatprep.subr.bf16.mxu1 %v401_v20 }
  0x46   :  { %367 = vmatpush3.bf16.msra.mxu1 %v402_v21 }
 0x102   :  { %v129_v29 = vpop.f32.mrb[0].mxu0 }
 0x103   :  { %v130_v30 = vadd.f32 %v129_v29, %v64_v27  ;;  %v131_v31 = vpop.f32.mrb[1].mxu0 }
 0x104   :  { %v132_v32 = vadd.f32 %v131_v31, %v68_v28  ;;  %v133_v33 = vpop.f32.mrb[2].mxu0 }
 0x105   :  { %v136_v34 = vmax.f32 %v130_v30, 0.0  ;;  %v134_v35 = vpop.f32.mrb[3].mxu0 }
 0x106   :  { %v137_v36 = vmax.f32 %v132_v32, 0.0 }
 0x107   :  { %v139_v38 = vpack.c.bf16 %v136_v34, %v136_v34 }
 0x108   :  { %v140_v37 = vpack.c.bf16 %v137_v36, %v137_v36 }
 0x10a   :  { %301 = vmatprep.mubr.bf16.mxu1 %v140_v37 }
 0x10b   :  { %302 = vmatmul.mubr.bf16.vlgmr.msra.gmra.mrb[0].mxu1 %v139_v38 }
 0x1de   :  { %v368_v39 = vpop.f32.mrb[0].mxu1 }
 0x1df   :  { %v369_v40 = vpop.f32.mrb[1].mxu1 }
 0x1e0   :  { %v370_v42 = vadd.f32 %v369_v40, %v368_v39  ;;  %v371_v43 = vpop.f32.mrb[2].mxu1 }
 0x1e1   :  { %v372_v44 = vpop.f32.mrb[3].mxu1 }
 0x1e2   :  { %v322_v45 = vadd.f32 %v370_v42, %v351_v41 }
 0x1e4   :  { %323 = vst [vmem:[%s529_s5] sm:$0xff] %v322_v45 }
 0x1e5   :  { %328 = vsyncpa [#allocation4], 1 }
 0x1e6   :  { %329 = vsyncpa [#allocation6], 1 }

// kernel: ensemble_forward.1
= control target key start
LH: loop header
LB: loop body
LE: loop exit
PB: predicated region body
PF: predicated region fallthrough
CT: control target
= control target key end

     0   :  { %10 = vsyncpa [#allocation4], 0  ;;  %s524_s0 = inlined_call_operand.vmem [shape: bf16[8,32], index: 0, kind: input, shape index: {}]   ;;  %s525_s1 = inlined_call_operand.hbm [shape: bf16[32,256], index: 1, kind: input, shape index: {}]   ;;  %s526_s2 = inlined_call_operand.vmem [shape: f32[1,256], index: 2, kind: input, shape index: {}]   ;;  %s527_s3 = inlined_call_operand.hbm [shape: bf16[256,128], index: 3, kind: input, shape index: {}]   ;;  %s528_s4 = inlined_call_operand.vmem [shape: f32[1,128], index: 4, kind: input, shape index: {}]   ;;  %s529_s5 = inlined_call_operand.vmem [shape: f32[8,128], index: 5, kind: output, shape index: {}]  }
   0x1   :  { %11 = vsyncpa [#allocation6], 0  ;;  %s451_s18 = smov [#allocation3]   ;;  %s403_s22 = scalar_lea.hbm %s525_s1, 512 }
   0x2   :  { %s19_s19 = sshll.u32 %s451_s18, 4  ;;  %p404_p0 = scmp.ne.s32.totalorder %s525_s1, %s403_s22  ;;  %s20_s19 = int_to_ptr.vmem [resolvable:$true] %s19_s19 }
   0x3   :  { %p407_p1 = scmp.lt.u32.totalorder %s403_s22, %s525_s1 }
   0x5   :  { %p409_p2 = pnand %p407_p1, %p404_p0 }
   0x7   :  { %412 = shalt.err (!%p409_p2)
}
   0x8   :  { %s413_s27 = scalar_lea.vmem %s20_s19, 512  ;;  %p418_p4 = scmp.lt.s32.totalorder %s20_s19, %s20_s19 }
   0x9   :  { %p414_p3 = scmp.ne.s32.totalorder %s20_s19, %s413_s27  ;;  %p419_p5 = scmp.lt.s32.totalorder %s413_s27, %s413_s27 }
   0xb   :  { %p420_p6 = por %p419_p5, %p418_p4 }
   0xd   :  { %p421_p7 = pnand %p420_p6, %p414_p3 }
   0xf   :  { %424 = shalt.err (!%p421_p7)
}
  0x10   :  { %s452_s28 = smov 128   ;;  %s453_s29 = smov 8  }
  0x11   :  { %25 = dma.hbm_to_vmem [thread:$0]  %s525_s1, 512, %s20_s19, [#allocation4], %s452_s28, %s452_s28, %s453_s29  }
  0x12   :  { %s454_s7 = smov [#allocation5]   ;;  %s425_s11 = scalar_lea.hbm %s527_s3, 2048 }
  0x13   :  { %s33_s8 = sshll.u32 %s454_s7, 4  ;;  %p426_p8 = scmp.ne.s32.totalorder %s527_s3, %s425_s11  ;;  %s34_s8 = int_to_ptr.vmem [resolvable:$true] %s33_s8 }
  0x14   :  { %p429_p9 = scmp.lt.u32.totalorder %s425_s11, %s527_s3 }
  0x16   :  { %p431_p10 = pnand %p429_p9, %p426_p8 }
  0x18   :  { %434 = shalt.err (!%p431_p10)
}
  0x19   :  { %s435_s16 = scalar_lea.vmem %s34_s8, 2048  ;;  %p440_p12 = scmp.lt.s32.totalorder %s34_s8, %s34_s8 }
  0x1a   :  { %p436_p11 = scmp.ne.s32.totalorder %s34_s8, %s435_s16  ;;  %p441_p13 = scmp.lt.s32.totalorder %s435_s16, %s435_s16 }
  0x1c   :  { %p442_p0 = por %p441_p13, %p440_p12 }
  0x1e   :  { %p443_p1 = pnand %p442_p0, %p436_p11 }
  0x20   :  { %446 = shalt.err (!%p443_p1)
}
  0x21   :  { %s455_s1 = smov 64   ;;  %s456_s17 = smov 4  }
  0x22   :  { %39 = dma.hbm_to_vmem [thread:$0]  %s527_s3, 2048, %s34_s8, [#allocation6], %s455_s1, %s455_s1, %s456_s17  }
  0x23   :  { %447 = dma.done.wait [#allocation4], 512  }
  0x24   :  { %448 = vsyncadd [#allocation4], 4294966784 }
  0x25   :  { %449 = dma.done.wait [#allocation6], 2048  }
  0x26   :  { %450 = vsyncadd [#allocation6], 4294965248  ;;  %v457_v0 = vmov 0   ;;  %v381_v1 = vld [vmem:[#allocation3 + $0x4] ss:$8 sps:$4 sm:$0xff]   ;;  %vm91_vm0 = vcmask 261120   ;;  %v61_v22 = vlaneseq }
  0x27   :  { %127 = vmatprep.mubr.bf16.mxu0 %v457_v0  ;;  %v383_v2 = vld [vmem:[#allocation3] ss:$8 sps:$4 sm:$0xff]   ;;  %95 = vmatprep.subr.bf16.mxu0 %v381_v1  ;;  %v384_v3 = vld [vmem:[#allocation3 + $0x14] ss:$8 sps:$4 sm:$0xff]   ;;  %v386_v4 = vld [vmem:[#allocation3 + $0x10] ss:$8 sps:$4 sm:$0xff]  }
  0x28   :  { %96 = vmatpush1.bf16.msra.mxu0 %v383_v2  ;;  %v387_v5 = vld [vmem:[#allocation5 + $0x40] sm:$0xff]   ;;  %v389_v8 = vld [vmem:[#allocation5 + $0x48] sm:$0xff]   ;;  %v391_v10 = vld [vmem:[#allocation5 + $0x50] sm:$0xff]   ;;  %v62_v23 = vshrl.u32 %v61_v22, 7 }
  0x29   :  { %97 = vmatprep.subr.bf16.mxu0 %v384_v3  ;;  %v388_v6 = vld [vmem:[#allocation5] sm:$0xff]   ;;  %352 = vmatprep.subr.bf16.mxu1 %v387_v5  ;;  %v390_v9 = vld [vmem:[#allocation5 + $0x8] sm:$0xff]   ;;  %v392_v11 = vld [vmem:[#allocation5 + $0x10] sm:$0xff]  }
  0x2a   :  { %v54_v7 = vld [vmem:[%s524_s0] sm:$0xf]  ;;  %353 = vmatpush3.bf16.msra.mxu1 %v388_v6  ;;  %v393_v12 = vld [vmem:[#allocation5 + $0x58] sm:$0xff]   ;;  %v397_v16 = vld [vmem:[#allocation5 + $0x68] sm:$0xff]   ;;  %v63_v24 = vsub.s32 0, %v62_v23  ;;  %v67_v26 = vsub.s32 1, %v62_v23 }
  0x2b   :  { %354 = vmatprep.subr.bf16.mxu1 %v389_v8  ;;  %v394_v13 = vld [vmem:[#allocation5 + $0x18] sm:$0xff]   ;;  %v395_v14 = vld [vmem:[#allocation5 + $0x60] sm:$0xff]   ;;  %v398_v17 = vld [vmem:[#allocation5 + $0x28] sm:$0xff]  }
  0x2c   :  { %98 = vmatpush1.bf16.msra.mxu0 %v386_v4  ;;  %v396_v15 = vld [vmem:[#allocation5 + $0x20] sm:$0xff]   ;;  %v399_v18 = vld [vmem:[#allocation5 + $0x70] sm:$0xff]   ;;  %v401_v20 = vld [vmem:[#allocation5 + $0x78] sm:$0xff]  }
  0x2d   :  { %v400_v19 = vld [vmem:[#allocation5 + $0x30] sm:$0xff]   ;;  %v402_v21 = vld [vmem:[#allocation5 + $0x38] sm:$0xff]   ;;  %v59_v25 = vld [vmem:[%s526_s2] sm:$0x3] }
  0x2e   :  { %355 = vmatpush3.bf16.msra.mxu1 %v390_v9  ;;  %v64_v27 = vrot.slane %v59_v25, %v63_v24  ;;  %v68_v28 = vrot.slane %v59_v25, %v67_v26  ;;  %v351_v41 = vld [vmem:[%s528_s4] ss:$0 sm:$0xff] }
  0x2f   :  { %334 = vmatmul.mubr.msk.bf16.vlgmr.msra.gmra.mrb[0].mxu0 %vm91_vm0, %v54_v7  ;;  %356 = vmatprep.subr.bf16.mxu1 %v391_v10 }
  0x32   :  { %357 = vmatpush3.bf16.msra.mxu1 %v392_v11 }
  0x33   :  { %358 = vmatprep.subr.bf16.mxu1 %v393_v12 }
  0x36   :  { %359 = vmatpush3.bf16.msra.mxu1 %v394_v13 }
  0x37   :  { %360 = vmatprep.subr.bf16.mxu1 %v395_v14 }
  0x3a   :  { %361 = vmatpush3.bf16.msra.mxu1 %v396_v15 }
  0x3b   :  { %362 = vmatprep.subr.bf16.mxu1 %v397_v16 }
  0x3e   :  { %363 = vmatpush3.bf16.msra.mxu1 %v398_v17 }
  0x3f   :  { %364 = vmatprep.subr.bf16.mxu1 %v399_v18 }
  0x42   :  { %365 = vmatpush3.bf16.msra.mxu1 %v400_v19 }
  0x43   :  { %366 = vmatprep.subr.bf16.mxu1 %v401_v20 }
  0x46   :  { %367 = vmatpush3.bf16.msra.mxu1 %v402_v21 }
 0x102   :  { %v129_v29 = vpop.f32.mrb[0].mxu0 }
 0x103   :  { %v130_v30 = vadd.f32 %v129_v29, %v64_v27  ;;  %v131_v31 = vpop.f32.mrb[1].mxu0 }
 0x104   :  { %v132_v32 = vadd.f32 %v131_v31, %v68_v28  ;;  %v133_v33 = vpop.f32.mrb[2].mxu0 }
 0x105   :  { %v136_v34 = vmax.f32 %v130_v30, 0.0  ;;  %v134_v35 = vpop.f32.mrb[3].mxu0 }
 0x106   :  { %v137_v36 = vmax.f32 %v132_v32, 0.0 }
 0x107   :  { %v139_v38 = vpack.c.bf16 %v136_v34, %v136_v34 }
 0x108   :  { %v140_v37 = vpack.c.bf16 %v137_v36, %v137_v36 }
 0x10a   :  { %301 = vmatprep.mubr.bf16.mxu1 %v140_v37 }
 0x10b   :  { %302 = vmatmul.mubr.bf16.vlgmr.msra.gmra.mrb[0].mxu1 %v139_v38 }
 0x1de   :  { %v368_v39 = vpop.f32.mrb[0].mxu1 }
 0x1df   :  { %v369_v40 = vpop.f32.mrb[1].mxu1 }
 0x1e0   :  { %v370_v42 = vadd.f32 %v369_v40, %v368_v39  ;;  %v371_v43 = vpop.f32.mrb[2].mxu1 }
 0x1e1   :  { %v372_v44 = vpop.f32.mrb[3].mxu1 }
 0x1e2   :  { %v322_v45 = vadd.f32 %v370_v42, %v351_v41 }
 0x1e4   :  { %323 = vst [vmem:[%s529_s5] sm:$0xff] %v322_v45 }
 0x1e5   :  { %328 = vsyncpa [#allocation4], 1 }
 0x1e6   :  { %329 = vsyncpa [#allocation6], 1 }

</bundles_post_ra>
